<compile_context>
chip_gen: v6e
topology: v6e:2x2x1
jax: 0.10.0
libtpu: 0.0.40
codegen_flags: <defaults>
</compile_context>

<pallas_src>
import functools
import numpy as np
import jax
import jax.numpy as jnp
from jax.experimental import pallas as pl
from jax.experimental.pallas import tpu as pltpu


def _gdeconv_kernel(x_ref, w_ref, b_ref, a_ref, o_ref, *, use_mxu):
    """One banded matmul -> lane-dense slab, then bias + PReLU, ONE store to o_ref."""
    bt, qg, din = x_ref.shape
    lw = o_ref.shape[-1]

    if use_mxu:
        x = x_ref[...].reshape(bt * qg, din)                      # bf16
        y = jnp.dot(x, w_ref[...], preferred_element_type=jnp.float32)
        y = y.reshape(bt, qg, lw)                                 # f32 accumulate
    else:
        # Tiny contraction dim: unrolled VPU broadcast-FMA (MXU would be <3% occupied
        # with all-padding columns on the systolic array).
        x3 = x_ref[...].astype(jnp.float32)                       # (bt, qg, din)
        w2 = w_ref[...].astype(jnp.float32)                       # (din, lw)
        y = x3[:, :, 0:1] * w2[0:1, :]
        for c in range(1, din):
            y = y + x3[:, :, c:c + 1] * w2[c:c + 1, :]

    # Bias + per-channel PReLU on the assembled slab; single full-block store.
    h = y + b_ref[...]
    o_ref[...] = jnp.where(h > 0.0, h, a_ref[...] * h)


def gdeconv1d_block(x_ncl, W, b, alpha, *, stride, kwidth, b_tile=None,
                    out_layout="ncl"):
    """x_ncl: (N, C_in, L_in) like PyTorch.  W: (C_in, F, K) ConvTranspose1d weight.
    Returns (N, F, L_out) ("ncl", PyTorch-compatible) or (N, L_out, F) ("nlc")."""
    N, C_in, L_in = x_ncl.shape
    Wc, F, K = W.shape
    assert Wc == C_in and K == kwidth

    pad = max(0, (stride - kwidth) // -2)
    L_out = (L_in - 1) * stride - 2 * pad + K
    if kwidth % 2 != 0:
        L_out -= 1                                  # h = h[:, :, :-1] for odd kwidth

    n_j = (K - 1) // stride + 1                     # taps contributing to each phase
    S = stride * F                                  # (phase r, feature f) lane pack
    G = 1 if S >= 128 else -(-128 // S)             # fold G phase-rows into lanes
    LW = G * S                                      # packed lane width (=128 here)
    Q = L_in + n_j - 1                              # phase-row extent of the deconv
    Qg = -(-Q // G)
    Q_pad = Qg * G
    D = G + n_j - 1                                 # im2col window (offsets per row)
    Din = D * C_in                                  # matmul contraction width

    # ---- batch tiling: >=2 grid steps (pipelining; v7x megacore) + VMEM budget ----
    if b_tile is None:
        bytes_per_sample = Qg * Din * 2 + Qg * LW * 4        # bf16 in + f32 out
        b_vmem = max(1, (8 * 1024 * 1024) // max(1, bytes_per_sample))
        b_rows = max(1, 512 // max(1, Qg))                   # target M ~ few hundred
        b_half = max(1, -(-N // 2))                          # keep NB >= 2 when N >= 2
        b_tile = max(1, min(N, b_vmem, b_rows, b_half))
    NB = -(-N // b_tile)
    N_pad = NB * b_tile

    # ---- im2col LHS: X3[b, g, d'*C + c] = x[b, g*G + d' - (n_j-1), c] (0 if OOB) ----
    x_nlc = jnp.transpose(x_ncl, (0, 2, 1))                          # (N, L_in, C)
    x_padt = jnp.pad(x_nlc, ((0, 0), (n_j - 1, Q_pad - L_in), (0, 0)))
    win = np.arange(Qg)[:, None] * G + np.arange(D)[None, :]         # static (Qg, D)
    x_cols = x_padt[:, win, :].reshape(N, Qg, Din)
    if N_pad != N:
        x_cols = jnp.pad(x_cols, ((0, N_pad - N), (0, 0), (0, 0)))
    x_cols = x_cols.astype(jnp.bfloat16)

    # ---- banded RHS: RHS[d'*C + c, p*S + r*F + f] = W[c, f, j*stride + r],
    #      j = p - d' + n_j - 1 if 0 <= j < n_j else 0.  Absorbs the overlap-add. ----
    K_pad = n_j * stride
    W_p = jnp.pad(W, ((0, 0), (0, 0), (0, K_pad - K)))               # (C, F, K_pad)
    W4 = W_p.reshape(C_in, F, n_j, stride)                           # [c, f, j, r]
    zero_blk = jnp.zeros((C_in, S), W_p.dtype)
    rows = []
    for dprime in range(D):
        cols = []
        for p in range(G):
            j = p - dprime + (n_j - 1)
            if 0 <= j < n_j:
                blk = jnp.transpose(W4[:, :, j, :], (0, 2, 1)).reshape(C_in, S)
            else:
                blk = zero_blk
            cols.append(blk)
        rows.append(jnp.concatenate(cols, axis=1))                   # (C, G*S)
    rhs = jnp.stack(rows, axis=0).reshape(D * C_in, LW).astype(jnp.bfloat16)

    # Bias / alpha pre-tiled to the packed (p, r, f) lane layout (lane % F == f).
    b_packed = jnp.tile(jnp.reshape(b, (1, F)), (1, G * stride)).astype(jnp.float32)
    a_packed = jnp.tile(jnp.reshape(alpha, (1, F)), (1, G * stride)).astype(jnp.float32)

    use_mxu = Din >= 64                         # VPU broadcast-FMA for tiny contraction
    kernel = functools.partial(_gdeconv_kernel, use_mxu=use_mxu)

    # Explicit VMEM accounting: double-buffered in/out blocks + weights + bias/alpha.
    block_bytes = (2 * b_tile * Qg * Din * 2 + 2 * b_tile * Qg * LW * 4
                   + Din * LW * 2 + 4 * LW * 4)
    vmem_limit = int(min(64 * 2 ** 20, max(16 * 2 ** 20, 4 * block_bytes)))

    out = pl.pallas_call(
        kernel,
        out_shape=jax.ShapeDtypeStruct((N_pad, Qg, LW), jnp.float32),
        grid=(NB,),
        in_specs=[
            pl.BlockSpec((b_tile, Qg, Din), lambda n: (n, 0, 0)),
            pl.BlockSpec((Din, LW), lambda n: (0, 0)),
            pl.BlockSpec((1, LW), lambda n: (0, 0)),
            pl.BlockSpec((1, LW), lambda n: (0, 0)),
        ],
        out_specs=pl.BlockSpec((b_tile, Qg, LW), lambda n: (n, 0, 0)),
        compiler_params=pltpu.CompilerParams(
            dimension_semantics=("parallel",),      # batch-tile axis shards across TCs
            vmem_limit_bytes=vmem_limit),
    )(x_cols, rhs, b_packed, a_packed)

    # Reassemble: lane index p*S + r*F + f at row g is output time t = (g*G+p)*stride+r.
    full = out.reshape(N_pad, Q_pad, stride, F).reshape(N_pad, Q_pad * stride, F)
    h = full[:N, pad:pad + L_out, :]                                 # (N, L_out, F)
    if out_layout == "nlc":
        return h                                   # channels-last, skips the relayout
    return jnp.transpose(h, (0, 2, 1))             # (N, F, L_out) — PyTorch NCL


def _ref_forward(x, W, b, alpha, stride, kwidth):
    """Pure numpy reference matching PyTorch ConvTranspose1d + trim + bias + PReLU."""
    x = np.asarray(x, np.float32)
    W = np.asarray(W, np.float32)
    N, C, L = x.shape
    _, F, K = W.shape
    pad = max(0, (stride - kwidth) // -2)
    L_full = (L - 1) * stride + K
    full = np.zeros((N, F, L_full), np.float32)
    for i in range(L):
        for k in range(K):
            full[:, :, i * stride + k] += np.einsum('nc,cf->nf', x[:, :, i], W[:, :, k])
    out = full[:, :, pad:L_full - pad]
    if kwidth % 2 != 0:
        out = out[:, :, :-1]
    out = out + np.asarray(b, np.float32)[None, :, None]
    a = np.asarray(alpha, np.float32)[None, :, None]
    return np.where(out > 0, out, a * out)


if __name__ == "__main__":
    # Module config: GDeconv1DBlock(ninp=4, fmaps=8, kwidth=8, stride=4)
    N, C_in, L_in = 2, 4, 16
    F, K, stride = 8, 8, 4

    key = jax.random.PRNGKey(0)
    kx, kw, kb = jax.random.split(key, 3)
    x = jax.random.normal(kx, (N, C_in, L_in), dtype=jnp.float32)
    # ConvTranspose1d weight shape: (in_channels, out_channels, kernel_size)
    W = jax.random.normal(kw, (C_in, F, K), dtype=jnp.float32) * 0.1
    b = jax.random.normal(kb, (F,), dtype=jnp.float32) * 0.1
    alpha = jnp.zeros((F,), dtype=jnp.float32)    # PReLU(fmaps, init=0)

    out = gdeconv1d_block(x, W, b, alpha, stride=stride, kwidth=K)
    out = jax.block_until_ready(out)

    # Reference on bf16-rounded inputs (the kernel casts x/W to bf16; accumulation f32).
    x_bf = np.asarray(x.astype(jnp.bfloat16).astype(jnp.float32))
    W_bf = np.asarray(W.astype(jnp.bfloat16).astype(jnp.float32))
    ref = _ref_forward(x_bf, W_bf, np.asarray(b), np.asarray(alpha), stride, K)
    assert out.shape == ref.shape, (out.shape, ref.shape)
    np.testing.assert_allclose(np.asarray(out), ref, atol=1e-3, rtol=1e-3)
    print("KERNEL_OK")
</pallas_src>

<mosaic_0001>
module attributes {stable_mosaic.version = 11 : i64} {
  func.func @_gdeconv_kernel(%arg0: i32, %arg1: memref<1x5x20xbf16, #tpu.memory_space<vmem>>, %arg2: memref<20x128xbf16, #tpu.memory_space<vmem>>, %arg3: memref<1x128xf32, #tpu.memory_space<vmem>>, %arg4: memref<1x128xf32, #tpu.memory_space<vmem>>, %arg5: memref<1x5x128xf32, #tpu.memory_space<vmem>>) attributes {dimension_semantics = [#tpu.dimension_semantics<parallel>], iteration_bounds = array<i64: 2>, scalar_prefetch = 0 : i64, scratch_operands = 0 : i64, tpu.core_type = #tpu.core_type<tc>, window_params = [{transform_indices = @transform_0, window_bounds = array<i64: 1, 5, 20>}, {pipeline_mode = #tpu.pipeline_mode<synchronous>, transform_indices = @transform_1, window_bounds = array<i64: 20, 128>}, {pipeline_mode = #tpu.pipeline_mode<synchronous>, transform_indices = @transform_2, window_bounds = array<i64: 1, 128>}, {pipeline_mode = #tpu.pipeline_mode<synchronous>, transform_indices = @transform_3, window_bounds = array<i64: 1, 128>}, {transform_indices = @transform_4, window_bounds = array<i64: 1, 5, 128>}]} {
    %c0 = arith.constant 0 : index
    %c0_0 = arith.constant 0 : index
    %c0_1 = arith.constant 0 : index
    %0 = vector.load %arg1[%c0, %c0_0, %c0_1] : memref<1x5x20xbf16, #tpu.memory_space<vmem>>, vector<1x5x20xbf16>
    %1 = arith.extf %0 : vector<1x5x20xbf16> to vector<1x5x20xf32>
    %c0_2 = arith.constant 0 : index
    %c0_3 = arith.constant 0 : index
    %2 = vector.load %arg2[%c0_2, %c0_3] : memref<20x128xbf16, #tpu.memory_space<vmem>>, vector<20x128xbf16>
    %3 = arith.extf %2 : vector<20x128xbf16> to vector<20x128xf32>
    %4 = vector.extract_strided_slice %1 {offsets = [0, 0, 0], sizes = [1, 5, 1], strides = [1, 1, 1]} : vector<1x5x20xf32> to vector<1x5x1xf32>
    %5 = vector.extract_strided_slice %3 {offsets = [0, 0], sizes = [1, 128], strides = [1, 1]} : vector<20x128xf32> to vector<1x128xf32>
    %6 = vector.shape_cast %5 : vector<1x128xf32> to vector<1x1x128xf32>
    %7 = vector.broadcast %4 : vector<1x5x1xf32> to vector<1x5x128xf32>
    %8 = vector.broadcast %6 : vector<1x1x128xf32> to vector<1x5x128xf32>
    %9 = arith.mulf %7, %8 : vector<1x5x128xf32>
    %10 = vector.extract_strided_slice %1 {offsets = [0, 0, 1], sizes = [1, 5, 1], strides = [1, 1, 1]} : vector<1x5x20xf32> to vector<1x5x1xf32>
    %11 = vector.extract_strided_slice %3 {offsets = [1, 0], sizes = [1, 128], strides = [1, 1]} : vector<20x128xf32> to vector<1x128xf32>
    %12 = vector.shape_cast %11 : vector<1x128xf32> to vector<1x1x128xf32>
    %13 = vector.broadcast %10 : vector<1x5x1xf32> to vector<1x5x128xf32>
    %14 = vector.broadcast %12 : vector<1x1x128xf32> to vector<1x5x128xf32>
    %15 = arith.mulf %13, %14 : vector<1x5x128xf32>
    %16 = arith.addf %9, %15 : vector<1x5x128xf32>
    %17 = vector.extract_strided_slice %1 {offsets = [0, 0, 2], sizes = [1, 5, 1], strides = [1, 1, 1]} : vector<1x5x20xf32> to vector<1x5x1xf32>
    %18 = vector.extract_strided_slice %3 {offsets = [2, 0], sizes = [1, 128], strides = [1, 1]} : vector<20x128xf32> to vector<1x128xf32>
    %19 = vector.shape_cast %18 : vector<1x128xf32> to vector<1x1x128xf32>
    %20 = vector.broadcast %17 : vector<1x5x1xf32> to vector<1x5x128xf32>
    %21 = vector.broadcast %19 : vector<1x1x128xf32> to vector<1x5x128xf32>
    %22 = arith.mulf %20, %21 : vector<1x5x128xf32>
    %23 = arith.addf %16, %22 : vector<1x5x128xf32>
    %24 = vector.extract_strided_slice %1 {offsets = [0, 0, 3], sizes = [1, 5, 1], strides = [1, 1, 1]} : vector<1x5x20xf32> to vector<1x5x1xf32>
    %25 = vector.extract_strided_slice %3 {offsets = [3, 0], sizes = [1, 128], strides = [1, 1]} : vector<20x128xf32> to vector<1x128xf32>
    %26 = vector.shape_cast %25 : vector<1x128xf32> to vector<1x1x128xf32>
    %27 = vector.broadcast %24 : vector<1x5x1xf32> to vector<1x5x128xf32>
    %28 = vector.broadcast %26 : vector<1x1x128xf32> to vector<1x5x128xf32>
    %29 = arith.mulf %27, %28 : vector<1x5x128xf32>
    %30 = arith.addf %23, %29 : vector<1x5x128xf32>
    %31 = vector.extract_strided_slice %1 {offsets = [0, 0, 4], sizes = [1, 5, 1], strides = [1, 1, 1]} : vector<1x5x20xf32> to vector<1x5x1xf32>
    %32 = vector.extract_strided_slice %3 {offsets = [4, 0], sizes = [1, 128], strides = [1, 1]} : vector<20x128xf32> to vector<1x128xf32>
    %33 = vector.shape_cast %32 : vector<1x128xf32> to vector<1x1x128xf32>
    %34 = vector.broadcast %31 : vector<1x5x1xf32> to vector<1x5x128xf32>
    %35 = vector.broadcast %33 : vector<1x1x128xf32> to vector<1x5x128xf32>
    %36 = arith.mulf %34, %35 : vector<1x5x128xf32>
    %37 = arith.addf %30, %36 : vector<1x5x128xf32>
    %38 = vector.extract_strided_slice %1 {offsets = [0, 0, 5], sizes = [1, 5, 1], strides = [1, 1, 1]} : vector<1x5x20xf32> to vector<1x5x1xf32>
    %39 = vector.extract_strided_slice %3 {offsets = [5, 0], sizes = [1, 128], strides = [1, 1]} : vector<20x128xf32> to vector<1x128xf32>
    %40 = vector.shape_cast %39 : vector<1x128xf32> to vector<1x1x128xf32>
    %41 = vector.broadcast %38 : vector<1x5x1xf32> to vector<1x5x128xf32>
    %42 = vector.broadcast %40 : vector<1x1x128xf32> to vector<1x5x128xf32>
    %43 = arith.mulf %41, %42 : vector<1x5x128xf32>
    %44 = arith.addf %37, %43 : vector<1x5x128xf32>
    %45 = vector.extract_strided_slice %1 {offsets = [0, 0, 6], sizes = [1, 5, 1], strides = [1, 1, 1]} : vector<1x5x20xf32> to vector<1x5x1xf32>
    %46 = vector.extract_strided_slice %3 {offsets = [6, 0], sizes = [1, 128], strides = [1, 1]} : vector<20x128xf32> to vector<1x128xf32>
    %47 = vector.shape_cast %46 : vector<1x128xf32> to vector<1x1x128xf32>
    %48 = vector.broadcast %45 : vector<1x5x1xf32> to vector<1x5x128xf32>
    %49 = vector.broadcast %47 : vector<1x1x128xf32> to vector<1x5x128xf32>
    %50 = arith.mulf %48, %49 : vector<1x5x128xf32>
    %51 = arith.addf %44, %50 : vector<1x5x128xf32>
    %52 = vector.extract_strided_slice %1 {offsets = [0, 0, 7], sizes = [1, 5, 1], strides = [1, 1, 1]} : vector<1x5x20xf32> to vector<1x5x1xf32>
    %53 = vector.extract_strided_slice %3 {offsets = [7, 0], sizes = [1, 128], strides = [1, 1]} : vector<20x128xf32> to vector<1x128xf32>
    %54 = vector.shape_cast %53 : vector<1x128xf32> to vector<1x1x128xf32>
    %55 = vector.broadcast %52 : vector<1x5x1xf32> to vector<1x5x128xf32>
    %56 = vector.broadcast %54 : vector<1x1x128xf32> to vector<1x5x128xf32>
    %57 = arith.mulf %55, %56 : vector<1x5x128xf32>
    %58 = arith.addf %51, %57 : vector<1x5x128xf32>
    %59 = vector.extract_strided_slice %1 {offsets = [0, 0, 8], sizes = [1, 5, 1], strides = [1, 1, 1]} : vector<1x5x20xf32> to vector<1x5x1xf32>
    %60 = vector.extract_strided_slice %3 {offsets = [8, 0], sizes = [1, 128], strides = [1, 1]} : vector<20x128xf32> to vector<1x128xf32>
    %61 = vector.shape_cast %60 : vector<1x128xf32> to vector<1x1x128xf32>
    %62 = vector.broadcast %59 : vector<1x5x1xf32> to vector<1x5x128xf32>
    %63 = vector.broadcast %61 : vector<1x1x128xf32> to vector<1x5x128xf32>
    %64 = arith.mulf %62, %63 : vector<1x5x128xf32>
    %65 = arith.addf %58, %64 : vector<1x5x128xf32>
    %66 = vector.extract_strided_slice %1 {offsets = [0, 0, 9], sizes = [1, 5, 1], strides = [1, 1, 1]} : vector<1x5x20xf32> to vector<1x5x1xf32>
    %67 = vector.extract_strided_slice %3 {offsets = [9, 0], sizes = [1, 128], strides = [1, 1]} : vector<20x128xf32> to vector<1x128xf32>
    %68 = vector.shape_cast %67 : vector<1x128xf32> to vector<1x1x128xf32>
    %69 = vector.broadcast %66 : vector<1x5x1xf32> to vector<1x5x128xf32>
    %70 = vector.broadcast %68 : vector<1x1x128xf32> to vector<1x5x128xf32>
    %71 = arith.mulf %69, %70 : vector<1x5x128xf32>
    %72 = arith.addf %65, %71 : vector<1x5x128xf32>
    %73 = vector.extract_strided_slice %1 {offsets = [0, 0, 10], sizes = [1, 5, 1], strides = [1, 1, 1]} : vector<1x5x20xf32> to vector<1x5x1xf32>
    %74 = vector.extract_strided_slice %3 {offsets = [10, 0], sizes = [1, 128], strides = [1, 1]} : vector<20x128xf32> to vector<1x128xf32>
    %75 = vector.shape_cast %74 : vector<1x128xf32> to vector<1x1x128xf32>
    %76 = vector.broadcast %73 : vector<1x5x1xf32> to vector<1x5x128xf32>
    %77 = vector.broadcast %75 : vector<1x1x128xf32> to vector<1x5x128xf32>
    %78 = arith.mulf %76, %77 : vector<1x5x128xf32>
    %79 = arith.addf %72, %78 : vector<1x5x128xf32>
    %80 = vector.extract_strided_slice %1 {offsets = [0, 0, 11], sizes = [1, 5, 1], strides = [1, 1, 1]} : vector<1x5x20xf32> to vector<1x5x1xf32>
    %81 = vector.extract_strided_slice %3 {offsets = [11, 0], sizes = [1, 128], strides = [1, 1]} : vector<20x128xf32> to vector<1x128xf32>
    %82 = vector.shape_cast %81 : vector<1x128xf32> to vector<1x1x128xf32>
    %83 = vector.broadcast %80 : vector<1x5x1xf32> to vector<1x5x128xf32>
    %84 = vector.broadcast %82 : vector<1x1x128xf32> to vector<1x5x128xf32>
    %85 = arith.mulf %83, %84 : vector<1x5x128xf32>
    %86 = arith.addf %79, %85 : vector<1x5x128xf32>
    %87 = vector.extract_strided_slice %1 {offsets = [0, 0, 12], sizes = [1, 5, 1], strides = [1, 1, 1]} : vector<1x5x20xf32> to vector<1x5x1xf32>
    %88 = vector.extract_strided_slice %3 {offsets = [12, 0], sizes = [1, 128], strides = [1, 1]} : vector<20x128xf32> to vector<1x128xf32>
    %89 = vector.shape_cast %88 : vector<1x128xf32> to vector<1x1x128xf32>
    %90 = vector.broadcast %87 : vector<1x5x1xf32> to vector<1x5x128xf32>
    %91 = vector.broadcast %89 : vector<1x1x128xf32> to vector<1x5x128xf32>
    %92 = arith.mulf %90, %91 : vector<1x5x128xf32>
    %93 = arith.addf %86, %92 : vector<1x5x128xf32>
    %94 = vector.extract_strided_slice %1 {offsets = [0, 0, 13], sizes = [1, 5, 1], strides = [1, 1, 1]} : vector<1x5x20xf32> to vector<1x5x1xf32>
    %95 = vector.extract_strided_slice %3 {offsets = [13, 0], sizes = [1, 128], strides = [1, 1]} : vector<20x128xf32> to vector<1x128xf32>
    %96 = vector.shape_cast %95 : vector<1x128xf32> to vector<1x1x128xf32>
    %97 = vector.broadcast %94 : vector<1x5x1xf32> to vector<1x5x128xf32>
    %98 = vector.broadcast %96 : vector<1x1x128xf32> to vector<1x5x128xf32>
    %99 = arith.mulf %97, %98 : vector<1x5x128xf32>
    %100 = arith.addf %93, %99 : vector<1x5x128xf32>
    %101 = vector.extract_strided_slice %1 {offsets = [0, 0, 14], sizes = [1, 5, 1], strides = [1, 1, 1]} : vector<1x5x20xf32> to vector<1x5x1xf32>
    %102 = vector.extract_strided_slice %3 {offsets = [14, 0], sizes = [1, 128], strides = [1, 1]} : vector<20x128xf32> to vector<1x128xf32>
    %103 = vector.shape_cast %102 : vector<1x128xf32> to vector<1x1x128xf32>
    %104 = vector.broadcast %101 : vector<1x5x1xf32> to vector<1x5x128xf32>
    %105 = vector.broadcast %103 : vector<1x1x128xf32> to vector<1x5x128xf32>
    %106 = arith.mulf %104, %105 : vector<1x5x128xf32>
    %107 = arith.addf %100, %106 : vector<1x5x128xf32>
    %108 = vector.extract_strided_slice %1 {offsets = [0, 0, 15], sizes = [1, 5, 1], strides = [1, 1, 1]} : vector<1x5x20xf32> to vector<1x5x1xf32>
    %109 = vector.extract_strided_slice %3 {offsets = [15, 0], sizes = [1, 128], strides = [1, 1]} : vector<20x128xf32> to vector<1x128xf32>
    %110 = vector.shape_cast %109 : vector<1x128xf32> to vector<1x1x128xf32>
    %111 = vector.broadcast %108 : vector<1x5x1xf32> to vector<1x5x128xf32>
    %112 = vector.broadcast %110 : vector<1x1x128xf32> to vector<1x5x128xf32>
    %113 = arith.mulf %111, %112 : vector<1x5x128xf32>
    %114 = arith.addf %107, %113 : vector<1x5x128xf32>
    %115 = vector.extract_strided_slice %1 {offsets = [0, 0, 16], sizes = [1, 5, 1], strides = [1, 1, 1]} : vector<1x5x20xf32> to vector<1x5x1xf32>
    %116 = vector.extract_strided_slice %3 {offsets = [16, 0], sizes = [1, 128], strides = [1, 1]} : vector<20x128xf32> to vector<1x128xf32>
    %117 = vector.shape_cast %116 : vector<1x128xf32> to vector<1x1x128xf32>
    %118 = vector.broadcast %115 : vector<1x5x1xf32> to vector<1x5x128xf32>
    %119 = vector.broadcast %117 : vector<1x1x128xf32> to vector<1x5x128xf32>
    %120 = arith.mulf %118, %119 : vector<1x5x128xf32>
    %121 = arith.addf %114, %120 : vector<1x5x128xf32>
    %122 = vector.extract_strided_slice %1 {offsets = [0, 0, 17], sizes = [1, 5, 1], strides = [1, 1, 1]} : vector<1x5x20xf32> to vector<1x5x1xf32>
    %123 = vector.extract_strided_slice %3 {offsets = [17, 0], sizes = [1, 128], strides = [1, 1]} : vector<20x128xf32> to vector<1x128xf32>
    %124 = vector.shape_cast %123 : vector<1x128xf32> to vector<1x1x128xf32>
    %125 = vector.broadcast %122 : vector<1x5x1xf32> to vector<1x5x128xf32>
    %126 = vector.broadcast %124 : vector<1x1x128xf32> to vector<1x5x128xf32>
    %127 = arith.mulf %125, %126 : vector<1x5x128xf32>
    %128 = arith.addf %121, %127 : vector<1x5x128xf32>
    %129 = vector.extract_strided_slice %1 {offsets = [0, 0, 18], sizes = [1, 5, 1], strides = [1, 1, 1]} : vector<1x5x20xf32> to vector<1x5x1xf32>
    %130 = vector.extract_strided_slice %3 {offsets = [18, 0], sizes = [1, 128], strides = [1, 1]} : vector<20x128xf32> to vector<1x128xf32>
    %131 = vector.shape_cast %130 : vector<1x128xf32> to vector<1x1x128xf32>
    %132 = vector.broadcast %129 : vector<1x5x1xf32> to vector<1x5x128xf32>
    %133 = vector.broadcast %131 : vector<1x1x128xf32> to vector<1x5x128xf32>
    %134 = arith.mulf %132, %133 : vector<1x5x128xf32>
    %135 = arith.addf %128, %134 : vector<1x5x128xf32>
    %136 = vector.extract_strided_slice %1 {offsets = [0, 0, 19], sizes = [1, 5, 1], strides = [1, 1, 1]} : vector<1x5x20xf32> to vector<1x5x1xf32>
    %137 = vector.extract_strided_slice %3 {offsets = [19, 0], sizes = [1, 128], strides = [1, 1]} : vector<20x128xf32> to vector<1x128xf32>
    %138 = vector.shape_cast %137 : vector<1x128xf32> to vector<1x1x128xf32>
    %139 = vector.broadcast %136 : vector<1x5x1xf32> to vector<1x5x128xf32>
    %140 = vector.broadcast %138 : vector<1x1x128xf32> to vector<1x5x128xf32>
    %141 = arith.mulf %139, %140 : vector<1x5x128xf32>
    %142 = arith.addf %135, %141 : vector<1x5x128xf32>
    %c0_4 = arith.constant 0 : index
    %c0_5 = arith.constant 0 : index
    %143 = vector.load %arg3[%c0_4, %c0_5] : memref<1x128xf32, #tpu.memory_space<vmem>>, vector<1x128xf32>
    %144 = vector.shape_cast %143 : vector<1x128xf32> to vector<1x1x128xf32>
    %145 = vector.broadcast %144 : vector<1x1x128xf32> to vector<1x5x128xf32>
    %146 = arith.addf %142, %145 : vector<1x5x128xf32>
    %cst = arith.constant 0.000000e+00 : f32
    %147 = vector.broadcast %cst : f32 to vector<1x5x128xf32>
    %148 = arith.cmpf ogt, %146, %147 : vector<1x5x128xf32>
    %c0_6 = arith.constant 0 : index
    %c0_7 = arith.constant 0 : index
    %149 = vector.load %arg4[%c0_6, %c0_7] : memref<1x128xf32, #tpu.memory_space<vmem>>, vector<1x128xf32>
    %150 = vector.shape_cast %149 : vector<1x128xf32> to vector<1x1x128xf32>
    %151 = vector.broadcast %150 : vector<1x1x128xf32> to vector<1x5x128xf32>
    %152 = arith.mulf %151, %146 : vector<1x5x128xf32>
    %153 = arith.select %148, %146, %152 : vector<1x5x128xi1>, vector<1x5x128xf32>
    %c0_8 = arith.constant 0 : index
    %c0_9 = arith.constant 0 : index
    %c0_10 = arith.constant 0 : index
    %154 = vector.load %arg5[%c0_8, %c0_9, %c0_10] : memref<1x5x128xf32, #tpu.memory_space<vmem>>, vector<1x5x128xf32>
    tpu.vector_store %arg5[%c0_8, %c0_9, %c0_10], %153 {strides = array<i32>} : memref<1x5x128xf32, #tpu.memory_space<vmem>>, vector<1x5x128xf32>,
    return
  }
  func.func @transform_0(%arg0: i32) -> (i32, i32, i32) {
    %c0_i32 = arith.constant 0 : i32
    %c0_i32_0 = arith.constant 0 : i32
    %c0_i32_1 = arith.constant 0 : i32
    return %arg0, %c0_i32, %c0_i32_0 : i32, i32, i32
  }
  func.func @transform_1(%arg0: i32) -> (i32, i32) {
    %c0_i32 = arith.constant 0 : i32
    %c0_i32_0 = arith.constant 0 : i32
    %c0_i32_1 = arith.constant 0 : i32
    return %c0_i32, %c0_i32_0 : i32, i32
  }
  func.func @transform_2(%arg0: i32) -> (i32, i32) {
    %c0_i32 = arith.constant 0 : i32
    %c0_i32_0 = arith.constant 0 : i32
    %c0_i32_1 = arith.constant 0 : i32
    return %c0_i32, %c0_i32_0 : i32, i32
  }
  func.func @transform_3(%arg0: i32) -> (i32, i32) {
    %c0_i32 = arith.constant 0 : i32
    %c0_i32_0 = arith.constant 0 : i32
    %c0_i32_1 = arith.constant 0 : i32
    return %c0_i32, %c0_i32_0 : i32, i32
  }
  func.func @transform_4(%arg0: i32) -> (i32, i32, i32) {
    %c0_i32 = arith.constant 0 : i32
    %c0_i32_0 = arith.constant 0 : i32
    %c0_i32_1 = arith.constant 0 : i32
    return %arg0, %c0_i32, %c0_i32_0 : i32, i32, i32
  }
}

</mosaic_0001>

<bundles_post_ra>
// kernel: tpu_custom_call.1
= control target key start
LH: loop header
LB: loop body
LE: loop exit
PB: predicated region body
PF: predicated region fallthrough
CT: control target
= control target key end

     0   :  { %s590_s15 = smov 0   ;;  %s653_s0 = inlined_call_operand.vmem [shape: bf16[2,5,20], index: 0, kind: input, shape index: {}]   ;;  %s654_s1 = inlined_call_operand.vmem [shape: bf16[20,128], index: 1, kind: input, shape index: {}]   ;;  %s655_s2 = inlined_call_operand.vmem [shape: f32[1,128], index: 2, kind: input, shape index: {}]   ;;  %s656_s3 = inlined_call_operand.vmem [shape: f32[1,128], index: 3, kind: input, shape index: {}]   ;;  %s657_s4 = inlined_call_operand.vmem [shape: f32[2,5,128], index: 4, kind: output, shape index: {}]  }
   0x1 LB: > { %s473_s16 = sadd.s32 4294967295, %s543_s15   ;;  %p477_p0 = scmp.ge.s32.totalorder %s543_s15, 1  ;;  %s543_s15 = sphi %s590_s15, %s14_s15  }
   0x2   : > { %p161_p1 = scmp.lt.s32.totalorder %s543_s15, 3 }
   0x4   : > { %p162_p2 = pnand %p477_p0, %p161_p1 }
   0x5   : > { %p185_p3 = scmp.lt.s32.totalorder (!%p162_p2), %s473_s16, 1 }
   0x6   : > { %165 = sbr.rel (%p162_p2) target bundleno = 211 (0xd3), region = 36 }
   0xb   : > { %v545_v0 = vmov 2   ;;  %v546_v1 = vmov 0   ;;  %s659_s16 = smov (!%p185_p3, %s473_s16), 1  ;;  %v547_v4 = vmov 3   ;;  %v548_v5 = vmov 1   ;;  %v485_v24 = vld [vmem:[%s654_s1] sm:$0xff]  }
   0xc   : > { %518 = vset.pattern.permute.xlu1 %v545_v0  ;;  %516 = vset.pattern.permute.xlu0 %v546_v1  ;;  %s478_s17 = sshll.u32 %s659_s16, 2  ;;  %v549_v6 = vmov 4   ;;  %v550_v7 = vmov 5   ;;  %v551_v8 = vmov 6   ;;  %v552_v9 = vmov 8   ;;  %s479_s27 = sshll.u32 %s659_s16, 3 }
   0xd   : > { %s188_s20 = scalar_lea.vmem %s653_s0, %s478_s17  ;;  %v553_v10 = vmov 7   ;;  %v554_v11 = vmov 11   ;;  %v555_v12 = vmov 9   ;;  %v556_v13 = vmov 14   ;;  %s192_s6 = scalar_lea.vmem %s657_s4, %s479_s27 }
   0xe   : > { %v193_v2 = vld [vmem:[%s188_s20] sm:$0x7]  ;;  %v557_v14 = vmov 10   ;;  %v558_v15 = vmov 17   ;;  %v559_v16 = vmov 12   ;;  %v560_v17 = vmov 19  }
   0xf   : > { %v194_v3 = vunpack.c.l.bf16 %v193_v2  ;;  %v561_v18 = vmov 13   ;;  %v562_v19 = vmov 15   ;;  %v563_v20 = vmov 16  }
  0x10   : > { %v564_v21 = vmov 18   ;;  %v206_v22 = vlaneseq  ;;  %v486_v26 = vunpack.c.l.bf16 %v485_v24  ;;  %v487_v58 = vunpack.c.h.bf16 %v485_v24 }
  0x11   : > { %222 = vperm.xlu1 %518, %v194_v3   ;;  %203 = vperm.xlu0 %516, %v194_v3  }
  0x12   : > { %v604_v23 = vshrl.u32 %v206_v22, 7 }
  0x14   : > { %v610_v25 = vsub.s32 0, %v604_v23  ;;  %v613_v27 = vsub.s32 1, %v604_v23  ;;  %v616_v28 = vsub.s32 2, %v604_v23  ;;  %v620_v32 = vsub.s32 3, %v604_v23 }
  0x15   : > { %519 = vset.pattern.permute.xlu1 %v547_v4  ;;  %517 = vset.pattern.permute.xlu0 %v548_v5  ;;  %v247_v34 = vsub.s32 4, %v604_v23  ;;  %v257_v39 = vsub.s32 5, %v604_v23  ;;  %v267_v46 = vsub.s32 6, %v604_v23  ;;  %v277_v55 = vsub.s32 7, %v604_v23 }
  0x16   : > { %232 = vperm.xlu1 %519, %v194_v3   ;;  %212 = vperm.xlu0 %517, %v194_v3   ;;  %v209_v30 = vrot.slane %v486_v26, %v610_v25  ;;  %v218_v33 = vrot.slane %v486_v26, %v613_v27  ;;  %v228_v35 = vrot.slane %v486_v26, %v616_v28 }
  0x17   : > { %v238_v40 = vrot.slane %v486_v26, %v620_v32  ;;  %v248_v42 = vrot.slane %v486_v26, %v247_v34  ;;  %v258_v45 = vrot.slane %v486_v26, %v257_v39  ;;  %v268_v54 = vrot.slane %v486_v26, %v267_v46 }
  0x18   : > { %v278_v61 = vrot.slane %v486_v26, %v277_v55  ;;  %v288_v62 = vrot.slane %v487_v58, %v610_v25  ;;  %v298_v5 = vrot.slane %v487_v58, %v613_v27  ;;  %v348_v22 = vrot.slane %v487_v58, %v267_v46  ;;  %v197_v26 = vld [vmem:[%s654_s1 + $0x8] sm:$0x3] }
  0x1a   : > { %520 = vset.pattern.permute.xlu1 %v549_v6  ;;  %521 = vset.pattern.permute.xlu0 %v550_v7 }
  0x1b   : > { %242 = vperm.xlu1 %520, %v194_v3   ;;  %252 = vperm.xlu0 %521, %v194_v3  }
  0x1f   : > { %522 = vset.pattern.permute.xlu1 %v551_v8  ;;  %524 = vset.pattern.permute.xlu0 %v552_v9  ;;  %v308_v9 = vrot.slane %v487_v58, %v616_v28 }
  0x20   : > { %262 = vperm.xlu1 %522, %v194_v3   ;;  %282 = vperm.xlu0 %524, %v194_v3  }
  0x24   : > { %523 = vset.pattern.permute.xlu1 %v553_v10  ;;  %527 = vset.pattern.permute.xlu0 %v554_v11  ;;  %v318_v10 = vrot.slane %v487_v58, %v620_v32 }
  0x25   : > { %272 = vperm.xlu1 %523, %v194_v3   ;;  %312 = vperm.xlu0 %527, %v194_v3  }
  0x29   : > { %525 = vset.pattern.permute.xlu1 %v555_v12  ;;  %530 = vset.pattern.permute.xlu0 %v556_v13 }
  0x2a   : > { %292 = vperm.xlu1 %525, %v194_v3   ;;  %342 = vperm.xlu0 %530, %v194_v3  }
  0x2e   : > { %526 = vset.pattern.permute.xlu1 %v557_v14  ;;  %533 = vset.pattern.permute.xlu0 %v558_v15 }
  0x2f   : > { %302 = vperm.xlu1 %526, %v194_v3   ;;  %372 = vperm.xlu0 %533, %v194_v3  }
  0x33   : > { %528 = vset.pattern.permute.xlu1 %v559_v16  ;;  %536 = vset.pattern.permute.xlu0 %v560_v17 }
  0x34   : > { %322 = vperm.xlu1 %528, %v194_v3  }
  0x38   : > { %529 = vset.pattern.permute.xlu1 %v561_v18 }
  0x39   : > { %332 = vperm.xlu1 %529, %v194_v3  }
  0x3d   : > { %531 = vset.pattern.permute.xlu1 %v562_v19 }
  0x3e   : > { %352 = vperm.xlu1 %531, %v194_v3  }
  0x42   : > { %532 = vset.pattern.permute.xlu1 %v563_v20 }
  0x43   : > { %362 = vperm.xlu1 %532, %v194_v3  }
  0x47   : > { %534 = vset.pattern.permute.xlu1 %v564_v21  ;;  %v338_v21 = vrot.slane %v487_v58, %v257_v39 }
  0x48   : > { %382 = vperm.xlu1 %534, %v194_v3  }
  0x4c   : > { %535 = vset.pattern.permute.xlu1 %v560_v17  ;;  %v328_v17 = vrot.slane %v487_v58, %v247_v34 }
  0x4d   : > { %392 = vperm.xlu1 %535, %v194_v3  }
  0x8c   : > { %v223_v29 = vpop.permute.xlu1 %222  ;;  %v204_v31 = vpop.permute.xlu0 %203 }
  0x8d   : > { %v210_v36 = vmul.f32 %v209_v30, %v204_v31  ;;  %v229_v43 = vmul.f32 %v228_v35, %v223_v29  ;;  %v358_v35 = vrot.slane %v487_v58, %v277_v55  ;;  %v481_v55 = vld [vmem:[%s656_s3] ss:$0 sm:$0xff] }
  0x91   : > { %v233_v37 = vpop.permute.xlu1 %232  ;;  %v213_v38 = vpop.permute.xlu0 %212 }
  0x92   : > { %v219_v41 = vmul.f32 %v218_v33, %v213_v38  ;;  %v239_v47 = vmul.f32 %v238_v40, %v233_v37 }
  0x94   : > { %v220_v44 = vadd.f32 %v219_v41, %v210_v36  ;;  %v200_v36 = vunpack.c.l.bf16 %v197_v26 }
  0x96   : > { %v230_v48 = vadd.f32 %v229_v43, %v220_v44  ;;  %v243_v49 = vpop.permute.xlu1 %242  ;;  %v253_v50 = vpop.permute.xlu0 %252  ;;  %v368_v40 = vrot.slane %v200_v36, %v610_v25  ;;  %v378_v39 = vrot.slane %v200_v36, %v613_v27  ;;  %v480_v25 = vld [vmem:[%s655_s2] ss:$0 sm:$0xff] }
  0x97   : > { %v249_v51 = vmul.f32 %v248_v42, %v243_v49  ;;  %v259_v53 = vmul.f32 %v258_v45, %v253_v50 }
  0x98   : > { %v240_v52 = vadd.f32 %v239_v47, %v230_v48  ;;  %v388_v47 = vrot.slane %v200_v36, %v616_v28 }
  0x9a   : > { %v250_v56 = vadd.f32 %v249_v51, %v240_v52  ;;  %v398_v51 = vrot.slane %v200_v36, %v620_v32 }
  0x9b   : > { %v263_v57 = vpop.permute.xlu1 %262  ;;  %v283_v0 = vpop.permute.xlu0 %282 }
  0x9c   : > { %v260_v59 = vadd.f32 %v259_v53, %v250_v56  ;;  %v269_v60 = vmul.f32 %v268_v54, %v263_v57  ;;  %v289_v4 = vmul.f32 %v288_v62, %v283_v0 }
  0x9e   : > { %v270_v1 = vadd.f32 %v269_v60, %v260_v59 }
  0xa0   : > { %v273_v63 = vpop.permute.xlu1 %272  ;;  %v313_v12 = vpop.permute.xlu0 %312 }
  0xa1   : > { %v279_v2 = vmul.f32 %v278_v61, %v273_v63  ;;  %v319_v16 = vmul.f32 %v318_v10, %v313_v12 }
  0xa3   : > { %v280_v3 = vadd.f32 %v279_v2, %v270_v1 }
  0xa5   : > { %v293_v6 = vpop.permute.xlu1 %292  ;;  %v290_v7 = vadd.f32 %v289_v4, %v280_v3  ;;  %v343_v24 = vpop.permute.xlu0 %342 }
  0xa6   : > { %v299_v8 = vmul.f32 %v298_v5, %v293_v6  ;;  %v349_v33 = vmul.f32 %v348_v22, %v343_v24 }
  0xa8   : > { %v300_v13 = vadd.f32 %v299_v8, %v290_v7 }
  0xaa   : > { %v303_v11 = vpop.permute.xlu1 %302  ;;  %v373_v42 = vpop.permute.xlu0 %372 }
  0xab   : > { %v309_v14 = vmul.f32 %v308_v9, %v303_v11  ;;  %v379_v46 = vmul.f32 %v378_v39, %v373_v42 }
  0xad   : > { %v310_v15 = vadd.f32 %v309_v14, %v300_v13 }
  0xaf   : > { %v323_v18 = vpop.permute.xlu1 %322  ;;  %v320_v19 = vadd.f32 %v319_v16, %v310_v15 }
  0xb0   : > { %v329_v20 = vmul.f32 %v328_v17, %v323_v18 }
  0xb2   : > { %v330_v29 = vadd.f32 %v329_v20, %v320_v19 }
  0xb4   : > { %v333_v23 = vpop.permute.xlu1 %332 }
  0xb5   : > { %v339_v30 = vmul.f32 %v338_v21, %v333_v23 }
  0xb7   : > { %v340_v31 = vadd.f32 %v339_v30, %v330_v29 }
  0xb9   : > { %v353_v37 = vpop.permute.xlu1 %352  ;;  %v350_v38 = vadd.f32 %v349_v33, %v340_v31 }
  0xba   : > { %v359_v34 = vmul.f32 %v358_v35, %v353_v37 }
  0xbc   : > { %v360_v43 = vadd.f32 %v359_v34, %v350_v38 }
  0xbe   : > { %v363_v41 = vpop.permute.xlu1 %362 }
  0xbf   : > { %v369_v44 = vmul.f32 %v368_v40, %v363_v41 }
  0xc1   : > { %v370_v45 = vadd.f32 %v369_v44, %v360_v43 }
  0xc3   : > { %v383_v48 = vpop.permute.xlu1 %382  ;;  %v380_v49 = vadd.f32 %v379_v46, %v370_v45 }
  0xc4   : > { %v389_v50 = vmul.f32 %v388_v47, %v383_v48 }
  0xc6   : > { %v390_v53 = vadd.f32 %v389_v50, %v380_v49 }
  0xc8   : > { %v393_v52 = vpop.permute.xlu1 %392 }
  0xc9   : > { %v399_v54 = vmul.f32 %v398_v51, %v393_v52 }
  0xcb   : > { %v400_v27 = vadd.f32 %v399_v54, %v390_v53 }
  0xcd   : > { %v408_v56 = vadd.f32 %v480_v25, %v400_v27 }
  0xcf   : > { %vm409_vm0 = vcmp.gt.f32.partialorder %v408_v56, 0.0  ;;  %v417_v28 = vmul.f32 %v481_v55, %v408_v56 }
  0xd1   : > { %v418_v32 = vsel %vm409_vm0, %v408_v56, %v417_v28 }
  0xd2   : > { %419 = vst [vmem:[%s192_s6] sm:$0x1f] %v418_v32 }
  0xd3 PF: > { %s14_s15 = sadd.s32 1, %s543_s15  }
  0xd4   : > { %p11_p4 = scmp.ge.s32.totalorder %s14_s15, 4  }
  0xd6   :  { %13 = sbr.rel (!%p11_p4) target bundleno = 1 (0x1), region = 66 }

</bundles_post_ra>
